<compile_context>
chip_gen: v5e
topology: v5e:2x2
jax: 0.10.0
libtpu: 0.0.40
codegen_flags: <defaults>
</compile_context>

<pallas_src>
import math

import jax
import jax.numpy as jnp
import numpy as np
from jax.experimental import pallas as pl
from jax.experimental.pallas import tpu as pltpu


def _dma_copy_kernel(x_hbm, o_hbm, sem):
    # Single HBM->HBM DMA of the whole payload; no on-core staging.
    cp = pltpu.make_async_copy(x_hbm, o_hbm, sem)
    cp.start()
    cp.wait()


def _pallas_materialize_copy(x):
    """Identity copy of `x` performed entirely by the DMA engine (HBM->HBM).

    Input and output keep the exact same shape/dtype, so layouts match and the
    copy is bit-identical regardless of rank, trailing-dim size, or dtype
    packing. No grid, no VMEM buffers, no per-step overhead.
    """
    return pl.pallas_call(
        _dma_copy_kernel,
        out_shape=jax.ShapeDtypeStruct(x.shape, x.dtype),
        in_specs=[pl.BlockSpec(memory_space=pl.ANY)],
        out_specs=pl.BlockSpec(memory_space=pl.ANY),
        scratch_shapes=[pltpu.SemaphoreType.DMA(())],
    )(x)


def _resolve_view_shape(x, shape):
    """Resolve the target shape (handles a single -1 wildcard, like torch.view)."""
    per_item = math.prod(x.shape[1:]) if x.ndim > 1 else 1
    shape = tuple(int(s) for s in shape)
    if shape.count(-1) > 1:
        raise ValueError("only one -1 is allowed in the view shape")
    if -1 in shape:
        known = math.prod(s for s in shape if s != -1)
        if known == 0 or per_item % known != 0:
            raise ValueError(f"view shape {shape} incompatible with input {x.shape}")
        shape = tuple(per_item // known if s == -1 else s for s in shape)
    if math.prod(shape) != per_item:
        raise ValueError(f"view shape {shape} incompatible with input {x.shape}")
    return shape


def view_forward(x, *shape, force_copy=False):
    """Pallas equivalent of `x.view(x.size(0), *shape)`.

    Default path is a metadata-only reshape (what torch.view actually does for
    contiguous tensors: zero data movement). Pass force_copy=True to route the
    payload through the Pallas HBM->HBM DMA copy kernel.
    """
    n = x.shape[0]
    shape = _resolve_view_shape(x, shape)

    if force_copy:
        x = _pallas_materialize_copy(x)

    # Metadata-only re-fold of the (already contiguous) payload.
    return x.reshape(n, *shape)


if __name__ == "__main__":
    key = jax.random.PRNGKey(0)
    x = jax.random.normal(key, (2, 4, 16, 16), dtype=jnp.float32)
    x_np = np.asarray(x)

    # 1) Default path: View(-1) as a metadata-only reshape (typical StyleGAN usage).
    y = jax.block_until_ready(view_forward(x, -1))
    assert y.shape == (2, 4 * 16 * 16)
    np.testing.assert_array_equal(np.asarray(y), x_np.reshape(2, -1))

    # 2) Pallas path: same view but with an explicit HBM->HBM DMA copy.
    y_copy = jax.block_until_ready(view_forward(x, -1, force_copy=True))
    assert y_copy.shape == (2, 4 * 16 * 16)
    np.testing.assert_array_equal(np.asarray(y_copy), x_np.reshape(2, -1))

    # 3) Pallas path with a multi-dim target shape: View(16, 8, 8).
    y2 = jax.block_until_ready(view_forward(x, 16, 8, 8, force_copy=True))
    assert y2.shape == (2, 16, 8, 8)
    np.testing.assert_array_equal(np.asarray(y2), x_np.reshape(2, 16, 8, 8))

    print("KERNEL_OK")
</pallas_src>

<mosaic_0001>
module attributes {stable_mosaic.version = 11 : i64} {
  func.func @_dma_copy_kernel(%arg0: memref<2x4x16x16xf32, #tpu.memory_space<any>>, %arg1: memref<2x4x16x16xf32, #tpu.memory_space<any>>, %arg2: memref<!tpu.dma_semaphore, #tpu.memory_space<semaphore_mem>>) attributes {dimension_semantics = [], scalar_prefetch = 0 : i64, scratch_operands = 1 : i64, tpu.core_type = #tpu.core_type<tc>} {
    tpu.enqueue_dma source(%arg0 : memref<2x4x16x16xf32, #tpu.memory_space<any>>) target(%arg1 : memref<2x4x16x16xf32, #tpu.memory_space<any>>) target_semaphore(%arg2 : memref<!tpu.dma_semaphore, #tpu.memory_space<semaphore_mem>>)
    tpu.wait_dma2 semaphore(%arg2 : memref<!tpu.dma_semaphore, #tpu.memory_space<semaphore_mem>>) src(%arg0 : memref<2x4x16x16xf32, #tpu.memory_space<any>>) dst(%arg1 : memref<2x4x16x16xf32, #tpu.memory_space<any>>)
    return
  }
}

</mosaic_0001>

<bundles_post_ra>
// kernel: tpu_custom_call.1
= control target key start
LH: loop header
LB: loop body
LE: loop exit
PB: predicated region body
PF: predicated region fallthrough
CT: control target
= control target key end

     0   :  { %s34_s12 = smov [#allocation2]   ;;  %s35_s13 = smov [#allocation3]   ;;  %s53_s0 = inlined_call_operand.hbm [shape: f32[2,4,16,16], index: 0, kind: input, shape index: {}]   ;;  %s54_s1 = inlined_call_operand.hbm [shape: f32[2,4,16,16], index: 1, kind: output, shape index: {}]  }
   0x1   :  { %s10_s8 = sshll.u32 %s53_s0, 4  ;;  %s12_s11 = sshll.u32 %s54_s1, 4  ;;  %s11_s8 = int_to_ptr.hbm [resolvable:$true] %s10_s8  ;;  %s13_s11 = int_to_ptr.hbm [resolvable:$true] %s12_s11 }
   0x2   :  { %s36_s14 = smov 0  }
   0x3   :  { %16 = dma.general %s11_s8, 2048, %s13_s11, %s34_s12, %s35_s13, [#allocation4], %s36_s14, 0  }
   0x4   :  { %32 = dma.done.wait [#allocation2], 2048 }
   0x5   :  { %33 = vsyncadd [#allocation2], 4294965248 }
   0x6   :  { %22 = vsyncmov [#allocation2] }
   0x9   :  { %s23_s15 = vpop.sfrf %22 }
   0xa   :  { %p28_p0 = scmp.ne.s32.totalorder %s23_s15, 0 }
   0xc   :  { %27 = shalt.err (%p28_p0)  }

</bundles_post_ra>
